<compile_context>
chip_gen: v6e
topology: v6e:2x2x1
jax: 0.10.0
libtpu: 0.0.40
codegen_flags: <defaults>
</compile_context>

<pallas_src>
import functools

import jax
import jax.numpy as jnp
import numpy as np
from jax.experimental import pallas as pl
from jax.experimental.pallas import tpu as pltpu

BN_EPS = 0.0001
_LANE = 128


def _round_up(x, m):
    return (x + m - 1) // m * m


def _pick_batch_block(N, H, WC, Ho, K_TOT, CPAD, budget_bytes=24 << 20):
    """Pick B = batch elements per grid step (stacked into the matmul M dim)."""
    def step_bytes(b):
        return 4 * (b * Ho * K_TOT          # LHS scratch
                    + 2 * b * H * WC        # double-buffered input block
                    + 2 * b * Ho * CPAD     # double-buffered conv block
                    + 2 * 2 * CPAD          # stats block
                    + 2 * K_TOT * CPAD)     # resident Toeplitz RHS

    divs = [d for d in range(1, N + 1) if N % d == 0]
    ok = [d for d in divs
          if step_bytes(d) <= budget_bytes
          and (N // d == 1 or (d * Ho) % 8 == 0)]   # (8,128) rule for conv slab
    if not ok:
        return N                                    # full batch, grid=(1,)
    best = max(ok)                                  # biggest MXU M dim
    if N // best == 1:
        # v7x: prefer >=2 grid steps (two TensorCores) if M stays >= 128.
        two_core = [d for d in ok if N // d >= 2 and d * Ho >= 128]
        if two_core:
            best = max(two_core)
    return best


def _make_conv_stats_kernel(KH, pad, H, Ho, WC, B, K_TOT):
    """Conv (single lane-dense MXU matmul over B stacked batch elems) + BN stats."""
    KWC = KH * WC

    def kernel(x_ref, t_ref, conv_ref, stats_ref, l_ref):
        # x_ref:     (B, H, WC)        unpadded input rows, channels-last
        # t_ref:     (K_TOT, CPAD)     packed block-Toeplitz weights
        # conv_ref:  (B*Ho, CPAD)      raw conv output, lane = wo*Cout + co
        # stats_ref: (1, 2, CPAD)      row 0: per-lane sum, row 1: sum of squares
        # l_ref:     (B*Ho, K_TOT)     stacked row-band LHS (VMEM scratch)

        # Build the LHS: chunk kh of row (b, ho) holds input row (ho + kh - pad)
        # flattened over (W, Cin). Every element is written exactly once — data
        # copy or explicit halo-zero — so no full zero pass and no dependence on
        # grid iteration 0 (megacore-safe). The W halo lives in T's zero rows.
        for kh in range(KH):                     # static unroll
            src0 = max(0, kh - pad)
            src1 = min(H, Ho + kh - pad)
            dst0 = src0 - (kh - pad)
            dst1 = dst0 + max(0, src1 - src0)
            c0 = kh * WC
            for b in range(B):
                r = b * Ho
                if dst0 > 0:                     # top H-halo rows
                    l_ref[r:r + dst0, c0:c0 + WC] = jnp.zeros(
                        (dst0, WC), jnp.float32)
                if src1 > src0:                  # real data rows
                    l_ref[r + dst0:r + dst1, c0:c0 + WC] = x_ref[b, src0:src1, :]
                if dst1 < Ho:                    # bottom H-halo rows
                    l_ref[r + dst1:r + Ho, c0:c0 + WC] = jnp.zeros(
                        (Ho - dst1, WC), jnp.float32)
        if K_TOT > KWC:
            # Lane padding of the packed K dim: T's matching rows are zero, but
            # zero here too so uninitialized VMEM (possibly NaN) cannot leak.
            l_ref[:, KWC:] = jnp.zeros((B * Ho, K_TOT - KWC), jnp.float32)

        # Single matmul: (B*Ho, K_TOT) @ (K_TOT, CPAD), f32 accumulate.
        # TODO(synk): bf16 operands would raise MXU throughput on v6e/v7x but
        # risk the 3e-4 comparison tolerance at K~200; kept f32 per review.
        y = jnp.dot(l_ref[...], t_ref[...], preferred_element_type=jnp.float32)
        conv_ref[...] = y

        # Fused one-pass BN partial statistics for this block (per output lane).
        stats_ref[0, 0:1, :] = jnp.sum(y, axis=0, keepdims=True)
        stats_ref[0, 1:2, :] = jnp.sum(y * y, axis=0, keepdims=True)

    return kernel


@functools.partial(jax.jit, static_argnames=("n", "ho", "wo", "cout"))
def _bn_relu_epilogue(conv_slab, stats, gamma, beta, *, n, ho, wo, cout):
    """Fold batch stats + affine, apply scale/bias + ReLU fused with the
    channel trim / reshape / NCHW transpose (one XLA fusion, no extra pass)."""
    lane_sum = jnp.sum(stats[:, 0, :], axis=0)
    lane_sq = jnp.sum(stats[:, 1, :], axis=0)
    ch_sum = lane_sum[:wo * cout].reshape(wo, cout).sum(axis=0)
    ch_sq = lane_sq[:wo * cout].reshape(wo, cout).sum(axis=0)
    count = n * ho * wo
    mean = ch_sum / count
    # TODO(synk): E[x^2]-E[x]^2 in f32 is cancellation-prone for |mean|>>std;
    # fine here, switch to a shifted/Welford reduction if that ever matters.
    var = ch_sq / count - mean * mean
    scale = gamma.astype(jnp.float32) * jax.lax.rsqrt(var + BN_EPS)
    bias = beta.astype(jnp.float32) - mean * scale
    y = conv_slab[:, :wo * cout].reshape(n, ho, wo, cout)
    out = jnp.maximum(y * scale + bias, 0.0)
    return jnp.transpose(out, (0, 3, 1, 2))


def conv_bn_relu(x_nchw, w_oihw, gamma, beta, padding=1):
    """Forward pass of ConvBnRelu2d. Inputs/weights in PyTorch NCHW / OIHW."""
    N, Cin, H, W = x_nchw.shape
    Cout, _, KH, KW = w_oihw.shape
    Ho = H + 2 * padding - KH + 1
    Wo = W + 2 * padding - KW + 1

    WC = W * Cin
    K_TOT = _round_up(KH * WC, _LANE)       # packed K dim (no per-kh padding)
    CPAD = _round_up(Wo * Cout, _LANE)      # lane-dense output width

    B = _pick_batch_block(N, H, WC, Ho, K_TOT, CPAD)
    G = N // B

    # ---- parameter preprocessing (once, parameter-sized) -------------------
    # Packed block-Toeplitz RHS: T[kh*WC + w_in*Cin + ci, wo*Cout + co]
    #   = W[co, ci, kh, w_in - wo + padding], zero outside the tap range or
    #     outside the image width (this implements the W zero-padding).
    w_np = np.asarray(w_oihw, dtype=np.float32)           # (Cout, Cin, KH, KW)
    T = np.zeros((K_TOT, CPAD), np.float32)
    for kh in range(KH):
        for wo in range(Wo):
            for kw in range(KW):
                w_in = wo + kw - padding
                if 0 <= w_in < W:
                    T[kh * WC + w_in * Cin:kh * WC + (w_in + 1) * Cin,
                      wo * Cout:(wo + 1) * Cout] = w_np[:, :, kh, kw].T
    T = jnp.asarray(T)

    # Input layout: NCHW -> (N, H, W*Cin) channels-last rows (no padded HBM copy).
    x_rows = jnp.transpose(x_nchw, (0, 2, 3, 1)).astype(jnp.float32).reshape(N, H, WC)

    # ---- single Pallas pass: convolution + per-block BN partial statistics --
    # TODO(synk): if DMA latency shows up in a profile at larger shapes, add
    # pipeline_mode=pl.Buffered(3) on the x_rows BlockSpec.
    conv_slab, stats = pl.pallas_call(
        _make_conv_stats_kernel(KH, padding, H, Ho, WC, B, K_TOT),
        grid_spec=pltpu.PrefetchScalarGridSpec(
            num_scalar_prefetch=0,
            grid=(G,),
            in_specs=[
                pl.BlockSpec((B, H, WC), lambda n: (n, 0, 0)),
                pl.BlockSpec((K_TOT, CPAD), lambda n: (0, 0)),
            ],
            out_specs=[
                pl.BlockSpec((B * Ho, CPAD), lambda n: (n, 0)),
                pl.BlockSpec((1, 2, CPAD), lambda n: (n, 0, 0)),
            ],
            scratch_shapes=[pltpu.VMEM((B * Ho, K_TOT), jnp.float32)],
        ),
        out_shape=(
            jax.ShapeDtypeStruct((N * Ho, CPAD), jnp.float32),
            jax.ShapeDtypeStruct((G, 2, CPAD), jnp.float32),
        ),
        compiler_params=pltpu.CompilerParams(
            dimension_semantics=(("parallel",) if G > 1 else ("arbitrary",)),
            vmem_limit_bytes=32 * 1024 * 1024),
    )(x_rows, T)

    # ---- fused XLA epilogue: BN fold + scale/bias + ReLU + trim/transpose ---
    # TODO(synk): running_mean / running_var buffer updates are stateful
    # training bookkeeping and do not affect the forward output; not reproduced.
    return _bn_relu_epilogue(conv_slab, stats, gamma, beta,
                             n=N, ho=Ho, wo=Wo, cout=Cout)


def reference(x, w, gamma, beta, padding=1):
    """Pure-JAX reference matching PyTorch Conv2d + BatchNorm2d(train) + ReLU."""
    y = jax.lax.conv_general_dilated(
        x, w, window_strides=(1, 1),
        padding=[(padding, padding), (padding, padding)],
        dimension_numbers=('NCHW', 'OIHW', 'NCHW'))
    mean = y.mean(axis=(0, 2, 3), keepdims=True)
    var = ((y - mean) ** 2).mean(axis=(0, 2, 3), keepdims=True)
    yn = (y - mean) * jax.lax.rsqrt(var + BN_EPS)
    out = yn * gamma.reshape(1, -1, 1, 1) + beta.reshape(1, -1, 1, 1)
    return jnp.maximum(out, 0.0)


if __name__ == "__main__":
    N, Cin, Cout, H, W, KH, KW, pad = 2, 4, 8, 16, 16, 7, 7, 1

    key = jax.random.PRNGKey(0)
    k1, k2, k3, k4 = jax.random.split(key, 4)

    # Deterministic synthetic parameters (shapes from the module __init__).
    x = jax.random.normal(k1, (N, Cin, H, W), jnp.float32)
    fan_in = Cin * KH * KW
    bound = 1.0 / float(np.sqrt(fan_in))
    w = jax.random.uniform(k2, (Cout, Cin, KH, KW), jnp.float32, -bound, bound)
    gamma = jax.random.uniform(k3, (Cout,), jnp.float32, 0.5, 1.5)
    beta = jax.random.uniform(k4, (Cout,), jnp.float32, -0.5, 0.5)

    out = conv_bn_relu(x, w, gamma, beta, padding=pad)
    out = jax.block_until_ready(out)

    ref = reference(x, w, gamma, beta, padding=pad)
    assert out.shape == (N, Cout, H + 2 * pad - KH + 1, W + 2 * pad - KW + 1)
    np.testing.assert_allclose(np.asarray(out), np.asarray(ref),
                               atol=3e-4, rtol=3e-4)
    print("KERNEL_OK")
</pallas_src>

<mosaic_0001>
module attributes {stable_mosaic.version = 11 : i64} {
  func.func @kernel(%arg0: i32, %arg1: memref<2x16x64xf32, #tpu.memory_space<vmem>>, %arg2: memref<512x128xf32, #tpu.memory_space<vmem>>, %arg3: memref<24x128xf32, #tpu.memory_space<vmem>>, %arg4: memref<1x2x128xf32, #tpu.memory_space<vmem>>, %arg5: memref<24x512xf32, #tpu.memory_space<vmem>>) attributes {dimension_semantics = [#tpu.dimension_semantics<arbitrary>], iteration_bounds = array<i64: 1>, scalar_prefetch = 0 : i64, scratch_operands = 1 : i64, tpu.core_type = #tpu.core_type<tc>, window_params = [{transform_indices = @transform_0, window_bounds = array<i64: 2, 16, 64>}, {pipeline_mode = #tpu.pipeline_mode<synchronous>, transform_indices = @transform_1, window_bounds = array<i64: 512, 128>}, {transform_indices = @transform_2, window_bounds = array<i64: 24, 128>}, {transform_indices = @transform_3, window_bounds = array<i64: 1, 2, 128>}]} {
    %cst = arith.constant 0.000000e+00 : f32
    %0 = vector.broadcast %cst : f32 to vector<1x64xf32>
    %c0 = arith.constant 0 : index
    %c0_0 = arith.constant 0 : index
    %1 = vector.load %arg5[%c0, %c0_0] : memref<24x512xf32, #tpu.memory_space<vmem>>, vector<1x64xf32>
    tpu.vector_store %arg5[%c0, %c0_0], %0 {strides = array<i32>} : memref<24x512xf32, #tpu.memory_space<vmem>>, vector<1x64xf32>,
    %c0_1 = arith.constant 0 : index
    %c0_2 = arith.constant 0 : index
    %c0_3 = arith.constant 0 : index
    %2 = vector.load %arg1[%c0_1, %c0_2, %c0_3] : memref<2x16x64xf32, #tpu.memory_space<vmem>>, vector<1x11x64xf32>
    %3 = vector.shape_cast %2 : vector<1x11x64xf32> to vector<11x64xf32>
    %c1 = arith.constant 1 : index
    %c0_4 = arith.constant 0 : index
    %4 = vector.load %arg5[%c1, %c0_4] : memref<24x512xf32, #tpu.memory_space<vmem>>, vector<11x64xf32>
    tpu.vector_store %arg5[%c1, %c0_4], %3 {strides = array<i32>} : memref<24x512xf32, #tpu.memory_space<vmem>>, vector<11x64xf32>,
    %cst_5 = arith.constant 0.000000e+00 : f32
    %5 = vector.broadcast %cst_5 : f32 to vector<1x64xf32>
    %c12 = arith.constant 12 : index
    %c0_6 = arith.constant 0 : index
    %6 = vector.load %arg5[%c12, %c0_6] : memref<24x512xf32, #tpu.memory_space<vmem>>, vector<1x64xf32>
    tpu.vector_store %arg5[%c12, %c0_6], %5 {strides = array<i32>} : memref<24x512xf32, #tpu.memory_space<vmem>>, vector<1x64xf32>,
    %c1_7 = arith.constant 1 : index
    %c0_8 = arith.constant 0 : index
    %c0_9 = arith.constant 0 : index
    %7 = vector.load %arg1[%c1_7, %c0_8, %c0_9] : memref<2x16x64xf32, #tpu.memory_space<vmem>>, vector<1x11x64xf32>
    %8 = vector.shape_cast %7 : vector<1x11x64xf32> to vector<11x64xf32>
    %c13 = arith.constant 13 : index
    %c0_10 = arith.constant 0 : index
    %9 = vector.load %arg5[%c13, %c0_10] : memref<24x512xf32, #tpu.memory_space<vmem>>, vector<11x64xf32>
    tpu.vector_store %arg5[%c13, %c0_10], %8 {strides = array<i32>} : memref<24x512xf32, #tpu.memory_space<vmem>>, vector<11x64xf32>,
    %c0_11 = arith.constant 0 : index
    %c0_12 = arith.constant 0 : index
    %c0_13 = arith.constant 0 : index
    %10 = vector.load %arg1[%c0_11, %c0_12, %c0_13] : memref<2x16x64xf32, #tpu.memory_space<vmem>>, vector<1x12x64xf32>
    %11 = vector.shape_cast %10 : vector<1x12x64xf32> to vector<12x64xf32>
    %c0_14 = arith.constant 0 : index
    %c64 = arith.constant 64 : index
    %12 = vector.load %arg5[%c0_14, %c64] : memref<24x512xf32, #tpu.memory_space<vmem>>, vector<12x64xf32>
    tpu.vector_store %arg5[%c0_14, %c64], %11 {strides = array<i32>} : memref<24x512xf32, #tpu.memory_space<vmem>>, vector<12x64xf32>,
    %c1_15 = arith.constant 1 : index
    %c0_16 = arith.constant 0 : index
    %c0_17 = arith.constant 0 : index
    %13 = vector.load %arg1[%c1_15, %c0_16, %c0_17] : memref<2x16x64xf32, #tpu.memory_space<vmem>>, vector<1x12x64xf32>
    %14 = vector.shape_cast %13 : vector<1x12x64xf32> to vector<12x64xf32>
    %c12_18 = arith.constant 12 : index
    %c64_19 = arith.constant 64 : index
    %15 = vector.load %arg5[%c12_18, %c64_19] : memref<24x512xf32, #tpu.memory_space<vmem>>, vector<12x64xf32>
    tpu.vector_store %arg5[%c12_18, %c64_19], %14 {strides = array<i32>} : memref<24x512xf32, #tpu.memory_space<vmem>>, vector<12x64xf32>,
    %c0_20 = arith.constant 0 : index
    %c1_21 = arith.constant 1 : index
    %c0_22 = arith.constant 0 : index
    %16 = vector.load %arg1[%c0_20, %c1_21, %c0_22] : memref<2x16x64xf32, #tpu.memory_space<vmem>>, vector<1x12x64xf32>
    %17 = vector.shape_cast %16 : vector<1x12x64xf32> to vector<12x64xf32>
    %c0_23 = arith.constant 0 : index
    %c128 = arith.constant 128 : index
    %18 = vector.load %arg5[%c0_23, %c128] : memref<24x512xf32, #tpu.memory_space<vmem>>, vector<12x64xf32>
    tpu.vector_store %arg5[%c0_23, %c128], %17 {strides = array<i32>} : memref<24x512xf32, #tpu.memory_space<vmem>>, vector<12x64xf32>,
    %c1_24 = arith.constant 1 : index
    %c1_25 = arith.constant 1 : index
    %c0_26 = arith.constant 0 : index
    %19 = vector.load %arg1[%c1_24, %c1_25, %c0_26] : memref<2x16x64xf32, #tpu.memory_space<vmem>>, vector<1x12x64xf32>
    %20 = vector.shape_cast %19 : vector<1x12x64xf32> to vector<12x64xf32>
    %c12_27 = arith.constant 12 : index
    %c128_28 = arith.constant 128 : index
    %21 = vector.load %arg5[%c12_27, %c128_28] : memref<24x512xf32, #tpu.memory_space<vmem>>, vector<12x64xf32>
    tpu.vector_store %arg5[%c12_27, %c128_28], %20 {strides = array<i32>} : memref<24x512xf32, #tpu.memory_space<vmem>>, vector<12x64xf32>,
    %c0_29 = arith.constant 0 : index
    %c2 = arith.constant 2 : index
    %c0_30 = arith.constant 0 : index
    %22 = vector.load %arg1[%c0_29, %c2, %c0_30] : memref<2x16x64xf32, #tpu.memory_space<vmem>>, vector<1x12x64xf32>
    %23 = vector.shape_cast %22 : vector<1x12x64xf32> to vector<12x64xf32>
    %c0_31 = arith.constant 0 : index
    %c192 = arith.constant 192 : index
    %24 = vector.load %arg5[%c0_31, %c192] : memref<24x512xf32, #tpu.memory_space<vmem>>, vector<12x64xf32>
    tpu.vector_store %arg5[%c0_31, %c192], %23 {strides = array<i32>} : memref<24x512xf32, #tpu.memory_space<vmem>>, vector<12x64xf32>,
    %c1_32 = arith.constant 1 : index
    %c2_33 = arith.constant 2 : index
    %c0_34 = arith.constant 0 : index
    %25 = vector.load %arg1[%c1_32, %c2_33, %c0_34] : memref<2x16x64xf32, #tpu.memory_space<vmem>>, vector<1x12x64xf32>
    %26 = vector.shape_cast %25 : vector<1x12x64xf32> to vector<12x64xf32>
    %c12_35 = arith.constant 12 : index
    %c192_36 = arith.constant 192 : index
    %27 = vector.load %arg5[%c12_35, %c192_36] : memref<24x512xf32, #tpu.memory_space<vmem>>, vector<12x64xf32>
    tpu.vector_store %arg5[%c12_35, %c192_36], %26 {strides = array<i32>} : memref<24x512xf32, #tpu.memory_space<vmem>>, vector<12x64xf32>,
    %c0_37 = arith.constant 0 : index
    %c3 = arith.constant 3 : index
    %c0_38 = arith.constant 0 : index
    %28 = vector.load %arg1[%c0_37, %c3, %c0_38] : memref<2x16x64xf32, #tpu.memory_space<vmem>>, vector<1x12x64xf32>
    %29 = vector.shape_cast %28 : vector<1x12x64xf32> to vector<12x64xf32>
    %c0_39 = arith.constant 0 : index
    %c256 = arith.constant 256 : index
    %30 = vector.load %arg5[%c0_39, %c256] : memref<24x512xf32, #tpu.memory_space<vmem>>, vector<12x64xf32>
    tpu.vector_store %arg5[%c0_39, %c256], %29 {strides = array<i32>} : memref<24x512xf32, #tpu.memory_space<vmem>>, vector<12x64xf32>,
    %c1_40 = arith.constant 1 : index
    %c3_41 = arith.constant 3 : index
    %c0_42 = arith.constant 0 : index
    %31 = vector.load %arg1[%c1_40, %c3_41, %c0_42] : memref<2x16x64xf32, #tpu.memory_space<vmem>>, vector<1x12x64xf32>
    %32 = vector.shape_cast %31 : vector<1x12x64xf32> to vector<12x64xf32>
    %c12_43 = arith.constant 12 : index
    %c256_44 = arith.constant 256 : index
    %33 = vector.load %arg5[%c12_43, %c256_44] : memref<24x512xf32, #tpu.memory_space<vmem>>, vector<12x64xf32>
    tpu.vector_store %arg5[%c12_43, %c256_44], %32 {strides = array<i32>} : memref<24x512xf32, #tpu.memory_space<vmem>>, vector<12x64xf32>,
    %c0_45 = arith.constant 0 : index
    %c4 = arith.constant 4 : index
    %c0_46 = arith.constant 0 : index
    %34 = vector.load %arg1[%c0_45, %c4, %c0_46] : memref<2x16x64xf32, #tpu.memory_space<vmem>>, vector<1x12x64xf32>
    %35 = vector.shape_cast %34 : vector<1x12x64xf32> to vector<12x64xf32>
    %c0_47 = arith.constant 0 : index
    %c320 = arith.constant 320 : index
    %36 = vector.load %arg5[%c0_47, %c320] : memref<24x512xf32, #tpu.memory_space<vmem>>, vector<12x64xf32>
    tpu.vector_store %arg5[%c0_47, %c320], %35 {strides = array<i32>} : memref<24x512xf32, #tpu.memory_space<vmem>>, vector<12x64xf32>,
    %c1_48 = arith.constant 1 : index
    %c4_49 = arith.constant 4 : index
    %c0_50 = arith.constant 0 : index
    %37 = vector.load %arg1[%c1_48, %c4_49, %c0_50] : memref<2x16x64xf32, #tpu.memory_space<vmem>>, vector<1x12x64xf32>
    %38 = vector.shape_cast %37 : vector<1x12x64xf32> to vector<12x64xf32>
    %c12_51 = arith.constant 12 : index
    %c320_52 = arith.constant 320 : index
    %39 = vector.load %arg5[%c12_51, %c320_52] : memref<24x512xf32, #tpu.memory_space<vmem>>, vector<12x64xf32>
    tpu.vector_store %arg5[%c12_51, %c320_52], %38 {strides = array<i32>} : memref<24x512xf32, #tpu.memory_space<vmem>>, vector<12x64xf32>,
    %c0_53 = arith.constant 0 : index
    %c5 = arith.constant 5 : index
    %c0_54 = arith.constant 0 : index
    %40 = vector.load %arg1[%c0_53, %c5, %c0_54] : memref<2x16x64xf32, #tpu.memory_space<vmem>>, vector<1x11x64xf32>
    %41 = vector.shape_cast %40 : vector<1x11x64xf32> to vector<11x64xf32>
    %c0_55 = arith.constant 0 : index
    %c384 = arith.constant 384 : index
    %42 = vector.load %arg5[%c0_55, %c384] : memref<24x512xf32, #tpu.memory_space<vmem>>, vector<11x64xf32>
    tpu.vector_store %arg5[%c0_55, %c384], %41 {strides = array<i32>} : memref<24x512xf32, #tpu.memory_space<vmem>>, vector<11x64xf32>,
    %cst_56 = arith.constant 0.000000e+00 : f32
    %43 = vector.broadcast %cst_56 : f32 to vector<1x64xf32>
    %c11 = arith.constant 11 : index
    %c384_57 = arith.constant 384 : index
    %44 = vector.load %arg5[%c11, %c384_57] : memref<24x512xf32, #tpu.memory_space<vmem>>, vector<1x64xf32>
    tpu.vector_store %arg5[%c11, %c384_57], %43 {strides = array<i32>} : memref<24x512xf32, #tpu.memory_space<vmem>>, vector<1x64xf32>,
    %c1_58 = arith.constant 1 : index
    %c5_59 = arith.constant 5 : index
    %c0_60 = arith.constant 0 : index
    %45 = vector.load %arg1[%c1_58, %c5_59, %c0_60] : memref<2x16x64xf32, #tpu.memory_space<vmem>>, vector<1x11x64xf32>
    %46 = vector.shape_cast %45 : vector<1x11x64xf32> to vector<11x64xf32>
    %c12_61 = arith.constant 12 : index
    %c384_62 = arith.constant 384 : index
    %47 = vector.load %arg5[%c12_61, %c384_62] : memref<24x512xf32, #tpu.memory_space<vmem>>, vector<11x64xf32>
    tpu.vector_store %arg5[%c12_61, %c384_62], %46 {strides = array<i32>} : memref<24x512xf32, #tpu.memory_space<vmem>>, vector<11x64xf32>,
    %cst_63 = arith.constant 0.000000e+00 : f32
    %48 = vector.broadcast %cst_63 : f32 to vector<1x64xf32>
    %c23 = arith.constant 23 : index
    %c384_64 = arith.constant 384 : index
    %49 = vector.load %arg5[%c23, %c384_64] : memref<24x512xf32, #tpu.memory_space<vmem>>, vector<1x64xf32>
    tpu.vector_store %arg5[%c23, %c384_64], %48 {strides = array<i32>} : memref<24x512xf32, #tpu.memory_space<vmem>>, vector<1x64xf32>,
    %cst_65 = arith.constant 0.000000e+00 : f32
    %50 = vector.broadcast %cst_65 : f32 to vector<24x64xf32>
    %c0_66 = arith.constant 0 : index
    %c448 = arith.constant 448 : index
    %51 = vector.load %arg5[%c0_66, %c448] : memref<24x512xf32, #tpu.memory_space<vmem>>, vector<24x64xf32>
    tpu.vector_store %arg5[%c0_66, %c448], %50 {strides = array<i32>} : memref<24x512xf32, #tpu.memory_space<vmem>>, vector<24x64xf32>,
    %c0_67 = arith.constant 0 : index
    %c0_68 = arith.constant 0 : index
    %52 = vector.load %arg5[%c0_67, %c0_68] : memref<24x512xf32, #tpu.memory_space<vmem>>, vector<24x512xf32>
    %c0_69 = arith.constant 0 : index
    %c0_70 = arith.constant 0 : index
    %53 = vector.load %arg2[%c0_69, %c0_70] : memref<512x128xf32, #tpu.memory_space<vmem>>, vector<512x128xf32>
    %cst_71 = arith.constant dense<0.000000e+00> : vector<24x128xf32>
    %54 = tpu.matmul %52, %53, %cst_71 {dimension_numbers = #tpu.dot_dimension_numbers<[1], [0], [0], [1], [0, 0, 1, 1], [], []>} : vector<24x512xf32>, vector<512x128xf32>, vector<24x128xf32> -> vector<24x128xf32>
    %c0_72 = arith.constant 0 : index
    %c0_73 = arith.constant 0 : index
    %55 = vector.load %arg3[%c0_72, %c0_73] : memref<24x128xf32, #tpu.memory_space<vmem>>, vector<24x128xf32>
    tpu.vector_store %arg3[%c0_72, %c0_73], %54 {strides = array<i32>} : memref<24x128xf32, #tpu.memory_space<vmem>>, vector<24x128xf32>,
    %cst_74 = arith.constant dense<0.000000e+00> : vector<128xf32>
    %56 = vector.multi_reduction <add>, %54, %cst_74 [0] : vector<24x128xf32> to vector<128xf32>
    %57 = vector.shape_cast %56 : vector<128xf32> to vector<1x128xf32>
    %c0_75 = arith.constant 0 : index
    %c0_76 = arith.constant 0 : index
    %c0_77 = arith.constant 0 : index
    %58 = vector.load %arg4[%c0_75, %c0_76, %c0_77] : memref<1x2x128xf32, #tpu.memory_space<vmem>>, vector<1x1x128xf32>
    %59 = vector.shape_cast %58 : vector<1x1x128xf32> to vector<1x128xf32>
    %60 = vector.shape_cast %57 : vector<1x128xf32> to vector<1x1x128xf32>
    tpu.vector_store %arg4[%c0_75, %c0_76, %c0_77], %60 {strides = array<i32>} : memref<1x2x128xf32, #tpu.memory_space<vmem>>, vector<1x1x128xf32>,
    %61 = arith.mulf %54, %54 : vector<24x128xf32>
    %cst_78 = arith.constant dense<0.000000e+00> : vector<128xf32>
    %62 = vector.multi_reduction <add>, %61, %cst_78 [0] : vector<24x128xf32> to vector<128xf32>
    %63 = vector.shape_cast %62 : vector<128xf32> to vector<1x128xf32>
    %c0_79 = arith.constant 0 : index
    %c1_80 = arith.constant 1 : index
    %c0_81 = arith.constant 0 : index
    %64 = vector.load %arg4[%c0_79, %c1_80, %c0_81] : memref<1x2x128xf32, #tpu.memory_space<vmem>>, vector<1x1x128xf32>
    %65 = vector.shape_cast %64 : vector<1x1x128xf32> to vector<1x128xf32>
    %66 = vector.shape_cast %63 : vector<1x128xf32> to vector<1x1x128xf32>
    tpu.vector_store %arg4[%c0_79, %c1_80, %c0_81], %66 {strides = array<i32>} : memref<1x2x128xf32, #tpu.memory_space<vmem>>, vector<1x1x128xf32>,
    return
  }
  func.func @transform_0(%arg0: i32) -> (i32, i32, i32) {
    %c0_i32 = arith.constant 0 : i32
    %c0_i32_0 = arith.constant 0 : i32
    %c0_i32_1 = arith.constant 0 : i32
    return %arg0, %c0_i32, %c0_i32_0 : i32, i32, i32
  }
  func.func @transform_1(%arg0: i32) -> (i32, i32) {
    %c0_i32 = arith.constant 0 : i32
    %c0_i32_0 = arith.constant 0 : i32
    %c0_i32_1 = arith.constant 0 : i32
    return %c0_i32, %c0_i32_0 : i32, i32
  }
  func.func @transform_2(%arg0: i32) -> (i32, i32) {
    %c0_i32 = arith.constant 0 : i32
    %c0_i32_0 = arith.constant 0 : i32
    return %arg0, %c0_i32 : i32, i32
  }
  func.func @transform_3(%arg0: i32) -> (i32, i32, i32) {
    %c0_i32 = arith.constant 0 : i32
    %c0_i32_0 = arith.constant 0 : i32
    %c0_i32_1 = arith.constant 0 : i32
    return %arg0, %c0_i32, %c0_i32_0 : i32, i32, i32
  }
}

</mosaic_0001>

<bundles_post_ra>
// kernel: tpu_custom_call.1
= control target key start
LH: loop header
LB: loop body
LE: loop exit
PB: predicated region body
PF: predicated region fallthrough
CT: control target
= control target key end

     0   :  { %9 = vsyncpa [#allocation4], 0  ;;  %s806_s0 = inlined_call_operand.hbm [shape: f32[2,16,64], index: 0, kind: input, shape index: {}]   ;;  %s807_s1 = inlined_call_operand.hbm [shape: f32[512,128], index: 1, kind: input, shape index: {}]   ;;  %s808_s2 = inlined_call_operand.hbm [shape: f32[24,128], index: 2, kind: output, shape index: {0}]   ;;  %s809_s3 = inlined_call_operand.hbm [shape: f32[1,2,128], index: 3, kind: output, shape index: {1}]  }
   0x1   :  { %10 = vsyncpa [#allocation7], 0 }
   0x2   :  { %11 = vsyncpa [#allocation5], 0 }
   0x3   :  { %12 = vsyncpa [#allocation10], 0  ;;  %s683_s12 = smov [#allocation3]  }
   0x4   :  { %s18_s13 = sshll.u32 %s683_s12, 4  ;;  %s19_s13 = int_to_ptr.vmem [resolvable:$true] %s18_s13 }
   0x5   :  { %s603_s14 = scalar_lea.vmem %s19_s13, 512  ;;  %p608_p1 = scmp.lt.s32.totalorder %s19_s13, %s19_s13 }
   0x6   :  { %p604_p0 = scmp.ne.s32.totalorder %s19_s13, %s603_s14  ;;  %p609_p2 = scmp.lt.s32.totalorder %s603_s14, %s603_s14 }
   0x8   :  { %p610_p3 = por %p609_p2, %p608_p1 }
   0xa   :  { %p611_p4 = pnand %p610_p3, %p604_p0 }
   0xc   :  { %614 = shalt.err (!%p611_p4)
}
   0xd   :  { %s684_s15 = smov 128   ;;  %s685_s16 = smov 8  }
   0xe   :  { %24 = dma.hbm_to_vmem [thread:$0]  %s806_s0, 512, %s19_s13, [#allocation4], %s684_s15, %s684_s15, %s685_s16  }
   0xf   :  { %s686_s19 = smov [#allocation6]  }
  0x10   :  { %s30_s20 = sshll.u32 %s686_s19, 4  ;;  %s31_s20 = int_to_ptr.vmem [resolvable:$true] %s30_s20 }
  0x11   :  { %s623_s21 = scalar_lea.vmem %s31_s20, 8192  ;;  %p628_p6 = scmp.lt.s32.totalorder %s31_s20, %s31_s20 }
  0x12   :  { %p624_p5 = scmp.ne.s32.totalorder %s31_s20, %s623_s21  ;;  %p629_p7 = scmp.lt.s32.totalorder %s623_s21, %s623_s21 }
  0x14   :  { %p630_p8 = por %p629_p7, %p628_p6 }
  0x16   :  { %p631_p9 = pnand %p630_p8, %p624_p5 }
  0x18   :  { %634 = shalt.err (!%p631_p9)
}
  0x19   :  { %36 = dma.hbm_to_vmem [thread:$0]  %s807_s1, 8192, %s31_s20, [#allocation7], %s684_s15, %s684_s15, %s685_s16  }
  0x1a   :  { %675 = dma.done.wait [#allocation4], 512  }
  0x1b   :  { %676 = vsyncadd [#allocation4], 4294966784 }
  0x1c   :  { %677 = dma.done.wait [#allocation7], 8192  }
  0x1d   :  { %678 = vsyncadd [#allocation7], 4294959104  ;;  %vm43_vm0 = vcmask 516096   ;;  %v687_v0 = vmov 0.0   ;;  %v164_v1 = vld [vmem:[#allocation3 + $0x4] sm:$0xff]  ;;  %s688_s0 = smov 64  }
  0x1e   :  { %196 = vst.msk [vmem:[#allocation2 + $0x3b] sm:$0x1] %vm43_vm0, %v687_v0  ;;  %209 = vst.msk [vmem:[#allocation2 + $0x5f] sm:$0x1] %vm43_vm0, %v687_v0  ;;  %v122_v2 = vld [vmem:[#allocation3 + $0x2] sm:$0xff]  ;;  %168 = vrot.lane.b32.xlu1 %v164_v1, %s688_s0  ;;  %v134_v5 = vld [vmem:[#allocation3 + $0x12] sm:$0xff] }
  0x1f   :  { %44 = vst.msk [vmem:[#allocation2] sm:$0x1] %vm43_vm0, %v687_v0  ;;  %59 = vst.msk [vmem:[#allocation2 + $0x24] sm:$0x1] %vm43_vm0, %v687_v0  ;;  %126 = vrot.lane.b32.xlu0 %v122_v2, %s688_s0  ;;  %v123_v3 = vld [vmem:[#allocation3 + $0xa] sm:$0xf] }
  0x20   :  { %v729_v4 = vld [vmem:[#allocation3] sm:$0xff]  ;;  %v288_v6 = vld [vmem:[#allocation6 + $0x1f8] sm:$0xff]  ;;  %v731_v7 = vld [vmem:[#allocation3 + $0x10] sm:$0xff]  ;;  %vm55_vm1 = vcmask 523265   ;;  %vm71_vm2 = vcmask 523269   ;;  %v138_v10 = vrot.slane %v134_v5, 4 }
  0x21   :  { %546 = vmatprep.subr.mxu1 %v288_v6  ;;  %v272_v8 = vld [vmem:[#allocation6 + $0x178] sm:$0xff]  ;;  %v287_v9 = vld [vmem:[#allocation6 + $0x1f0] sm:$0xff]  ;;  %v50_v13 = vrot.slane %v729_v4, 7  ;;  %v66_v14 = vrot.slane %v731_v7, 3  ;;  %v76_v15 = vld [vmem:[#allocation3 + $0x8] sm:$0xf] }
  0x22   :  { %128 = vrot.lane.b32.xlu1 %v123_v3, %s688_s0  ;;  %v271_v11 = vld [vmem:[#allocation6 + $0x170] sm:$0xff]  ;;  %v256_v12 = vld [vmem:[#allocation6 + $0xf8] sm:$0xff]  ;;  %547 = vmatpush3.msra.mxu1 %v272_v8  ;;  %v286_v19 = vld [vmem:[#allocation6 + $0x1e8] sm:$0xff]  ;;  %v94_v23 = vrot.slane %v731_v7, 4  ;;  %vm93_vm3 = vcmask 1043456   ;;  %vm73_vm4 = vcmask 523264  }
  0x23   :  { %79 = vrot.lane.b32.xlu0 %v729_v4, %s688_s0  ;;  %505 = vmatprep.subr.mxu0 %v256_v12  ;;  %v240_v16 = vld [vmem:[#allocation6 + $0x78] sm:$0xff]  ;;  %v255_v17 = vld [vmem:[#allocation6 + $0xf0] sm:$0xff]  ;;  %56 = vst.msk [vmem:[#allocation2] sm:$0xfe] %vm55_vm1, %v50_v13  ;;  %v270_v21 = vld [vmem:[#allocation6 + $0x168] sm:$0xff]  ;;  %vm85_vm5 = vcmask 1048064  }
  0x24   :  { %v135_v18 = vld [vmem:[#allocation3 + $0x1a] sm:$0xf]  ;;  %548 = vmatprep.subr.mxu1 %v287_v9  ;;  %506 = vmatpush3.msra.mxu0 %v240_v16  ;;  %v239_v20 = vld [vmem:[#allocation6 + $0x70] sm:$0xff]  ;;  %72 = vst.msk [vmem:[#allocation2 + $0x20] sm:$0xe0] %vm71_vm2, %v66_v14  ;;  %v254_v22 = vld [vmem:[#allocation6 + $0xe8] sm:$0xff] }
  0x25   :  { %549 = vmatpush3.msra.mxu1 %v271_v11  ;;  %507 = vmatprep.subr.mxu0 %v255_v17  ;;  %v285_v24 = vld [vmem:[#allocation6 + $0x1e0] sm:$0xff]  ;;  %v238_v25 = vld [vmem:[#allocation6 + $0x68] sm:$0xff]  ;;  %v139_v27 = vrot.slane %v135_v18, 4  ;;  %v176_v28 = vld [vmem:[#allocation3 + $0x14] sm:$0xff]  ;;  %vm57_vm6 = vcmask 519168   ;;  %vm194_vm7 = vcmask 518144  }
  0x26   :  { %81 = vrot.lane.b32.xlu1 %v76_v15, %s688_s0  ;;  %v165_v26 = vld [vmem:[#allocation3 + $0xc] sm:$0xf]  ;;  %v177_v29 = vld [vmem:[#allocation3 + $0x1c] sm:$0xf]  ;;  %550 = vmatprep.subr.mxu1 %v286_v19  ;;  %v90_v30 = vld [vmem:[#allocation3 + $0x18] sm:$0xf] }
  0x27   :  { %141 = vrot.lane.b32.xlu0 %v138_v10, %s688_s0  ;;  %508 = vmatpush3.msra.mxu0 %v239_v20  ;;  %v269_v31 = vld [vmem:[#allocation6 + $0x160] sm:$0xff]  ;;  %v284_v33 = vld [vmem:[#allocation6 + $0x1d8] sm:$0xff]  ;;  %v180_v35 = vrot.slane %v176_v28, 4  ;;  %v140_v38 = vsel %vm93_vm3, %v138_v10, %v139_v27  ;;  %v181_v39 = vrot.slane %v177_v29, 4  ;;  %v95_v40 = vrot.slane %v90_v30, 4  ;;  %v283_v41 = vld [vmem:[#allocation6 + $0x1d0] sm:$0xff] }
  0x28   :  { %551 = vmatpush3.msra.mxu1 %v270_v21  ;;  %509 = vmatprep.subr.mxu0 %v254_v22  ;;  %v253_v32 = vld [vmem:[#allocation6 + $0xe0] sm:$0xff]  ;;  %v268_v36 = vld [vmem:[#allocation6 + $0x158] sm:$0xff]  ;;  %v267_v43 = vld [vmem:[#allocation6 + $0x150] sm:$0xff]  ;;  %vm49_vm8 = vcmask 1040384   ;;  %vm119_vm9 = vcmask 523268   ;;  %vm207_vm10 = vcmask 522240  }
  0x29   :  { %552 = vmatprep.subr.mxu1 %v285_v24  ;;  %510 = vmatpush3.msra.mxu0 %v238_v25  ;;  %v237_v34 = vld [vmem:[#allocation6 + $0x60] sm:$0xff]  ;;  %v252_v37 = vld [vmem:[#allocation6 + $0xd8] sm:$0xff]  ;;  %v251_v44 = vld [vmem:[#allocation6 + $0xd0] sm:$0xff]  ;;  %v182_v47 = vsel %vm93_vm3, %v180_v35, %v181_v39  ;;  %v96_v48 = vsel %vm93_vm3, %v94_v23, %v95_v40  ;;  %vm65_vm11 = vcmask 1044480   ;;  %vm87_vm12 = vcmask 1043968   ;;  %s689_s1 = smov [#allocation8]  }
  0x2a   :  { %170 = vrot.lane.b32.xlu1 %v165_v26, %s688_s0  ;;  %553 = vmatpush3.msra.mxu1 %v269_v31  ;;  %v236_v42 = vld [vmem:[#allocation6 + $0x58] sm:$0xff]  ;;  %v282_v45 = vld [vmem:[#allocation6 + $0x1c8] sm:$0xff]  ;;  %v235_v46 = vld [vmem:[#allocation6 + $0x50] sm:$0xff]  ;;  %vm103_vm13 = vcmask 1048068   ;;  %s478_s24 = sshll.u32 %s689_s1, 4  ;;  %s479_s24 = int_to_ptr.vmem [resolvable:$true] %s478_s24 }
  0x2b   :  { %97 = vrot.lane.b32.xlu0 %v94_v23, %s688_s0  ;;  %511 = vmatprep.subr.mxu0 %v253_v32  ;;  %v266_v49 = vld [vmem:[#allocation6 + $0x148] sm:$0xff]  ;;  %v281_v54 = vld [vmem:[#allocation6 + $0x1c0] sm:$0xff]  ;;  %v280_v58 = vld [vmem:[#allocation6 + $0x1b8] sm:$0xff]  ;;  %s635_s25 = scalar_lea.vmem %s479_s24, 384  ;;  %p640_p11 = scmp.lt.s32.totalorder %s479_s24, %s479_s24 }
  0x2c   :  { %554 = vmatprep.subr.mxu1 %v284_v33  ;;  %512 = vmatpush3.msra.mxu0 %v237_v34  ;;  %v191_v50 = vld [vmem:[#allocation3 + $0x5] sm:$0xff]  ;;  %v264_v61 = vld [vmem:[#allocation6 + $0x138] sm:$0xff]  ;;  %v279_v62 = vld [vmem:[#allocation6 + $0x1b0] sm:$0xff]  ;;  %p636_p10 = scmp.ne.s32.totalorder %s479_s24, %s635_s25  ;;  %p641_p12 = scmp.lt.s32.totalorder %s635_s25, %s635_s25 }
  0x2d   :  { %555 = vmatpush3.msra.mxu1 %v268_v36  ;;  %513 = vmatprep.subr.mxu0 %v252_v37  ;;  %v250_v51 = vld [vmem:[#allocation6 + $0xc8] sm:$0xff]  ;;  %193 = vst.msk [vmem:[#allocation2 + $0x18] sm:$0xff] %vm73_vm4, %v191_v50  ;;  %v265_v56 = vld [vmem:[#allocation6 + $0x140] sm:$0xff]  ;;  %v248_v63 = vld [vmem:[#allocation6 + $0xb8] sm:$0xff] }
  0x2e   :  { %143 = vrot.lane.b32.xlu1 %v140_v38, %s688_s0  ;;  %556 = vmatprep.subr.mxu1 %v283_v41  ;;  %v149_v52 = vld [vmem:[#allocation3 + $0x3] sm:$0xff]  ;;  %210 = vst.msk [vmem:[#allocation2 + $0x18] sm:$0xff] %vm85_vm5, %v687_v0  ;;  %v263_v1 = vld [vmem:[#allocation6 + $0x130] sm:$0xff]  ;;  %v232_v3 = vld [vmem:[#allocation6 + $0x38] sm:$0xff]  ;;  %p642_p13 = por %p641_p12, %p640_p11 }
  0x2f   :  { %183 = vrot.lane.b32.xlu0 %v180_v35, %s688_s0  ;;  %514 = vmatpush3.msra.mxu0 %v236_v42  ;;  %v106_v53 = vld [vmem:[#allocation3 + $0x1] sm:$0xff]  ;;  %151 = vst.msk [vmem:[#allocation2 + $0x10] sm:$0xff] %vm73_vm4, %v149_v52  ;;  %v107_v60 = vld [vmem:[#allocation3 + $0x9] sm:$0xf]  ;;  %v247_v6 = vld [vmem:[#allocation6 + $0xb0] sm:$0xff] }
  0x30   :  { %557 = vmatpush3.msra.mxu1 %v267_v43  ;;  %515 = vmatprep.subr.mxu0 %v251_v44  ;;  %v234_v55 = vld [vmem:[#allocation6 + $0x48] sm:$0xff]  ;;  %108 = vst.msk [vmem:[#allocation2 + $0x8] sm:$0xff] %vm73_vm4, %v106_v53  ;;  %v249_v57 = vld [vmem:[#allocation6 + $0xc0] sm:$0xff]  ;;  %v110_v9 = vld [vmem:[#allocation3 + $0x11] sm:$0xff]  ;;  %p643_p0 = pnand %p642_p13, %p636_p10 }
  0x31   :  { %558 = vmatprep.subr.mxu1 %v282_v45  ;;  %516 = vmatpush3.msra.mxu0 %v235_v46  ;;  %v233_v59 = vld [vmem:[#allocation6 + $0x40] sm:$0xff]  ;;  %109 = vst.msk [vmem:[#allocation2 + $0x28] sm:$0xf] %vm57_vm6, %v107_v60  ;;  %v278_v2 = vld [vmem:[#allocation6 + $0x1a8] sm:$0xff]  ;;  %v231_v11 = vld [vmem:[#allocation6 + $0x30] sm:$0xff]  ;;  %v114_v15 = vrot.slane %v110_v9, 4 }
  0x32   :  { %185 = vrot.lane.b32.xlu1 %v182_v47, %s688_s0  ;;  %559 = vmatpush3.msra.mxu1 %v266_v49  ;;  %v262_v5 = vld [vmem:[#allocation6 + $0x128] sm:$0xff]  ;;  %v277_v10 = vld [vmem:[#allocation6 + $0x1a0] sm:$0xff]  ;;  %v197_v17 = vld [vmem:[#allocation3 + $0x15] sm:$0xff] }
  0x33   :  { %99 = vrot.lane.b32.xlu0 %v96_v48, %s688_s0  ;;  %517 = vmatprep.subr.mxu0 %v250_v51  ;;  %v46_v8 = vld [vmem:[#allocation3 + $0x8] sm:$0x7]  ;;  %v192_v16 = vld [vmem:[#allocation3 + $0xd] sm:$0x7]  ;;  %v261_v18 = vld [vmem:[#allocation6 + $0x120] sm:$0xff]  ;;  %v201_v21 = vrot.slane %v197_v17, 4 }
  0x34   :  { %560 = vmatprep.subr.mxu1 %v281_v54  ;;  %518 = vmatpush3.msra.mxu0 %v234_v55  ;;  %v51_v12 = vrot.slane %v46_v8, 7  ;;  %v246_v19 = vld [vmem:[#allocation6 + $0xa8] sm:$0xff]  ;;  %195 = vst.msk [vmem:[#allocation2 + $0x38] sm:$0x7] %vm194_vm7, %v192_v16  ;;  %v198_v20 = vld [vmem:[#allocation3 + $0x1d] sm:$0x7] }
  0x35   :  { %561 = vmatpush3.msra.mxu1 %v265_v56  ;;  %519 = vmatprep.subr.mxu0 %v249_v57  ;;  %v276_v22 = vld [vmem:[#allocation6 + $0x198] sm:$0xff]  ;;  %v230_v23 = vld [vmem:[#allocation6 + $0x28] sm:$0xff]  ;;  %v245_v24 = vld [vmem:[#allocation6 + $0xa0] sm:$0xff]  ;;  %120 = vst.msk [vmem:[#allocation2 + $0x28] sm:$0xf0] %vm119_vm9, %v114_v15  ;;  %v202_v26 = vrot.slane %v198_v20, 4 }
  0x36   :  { %562 = vmatprep.subr.mxu1 %v280_v58  ;;  %520 = vmatpush3.msra.mxu0 %v233_v59  ;;  %v52_v25 = vsel %vm49_vm8, %v50_v13, %v51_v12  ;;  %v150_v27 = vld [vmem:[#allocation3 + $0xb] sm:$0xf]  ;;  %206 = vst.msk [vmem:[#allocation2 + $0x38] sm:$0xf0] %vm119_vm9, %v201_v21  ;;  %v111_v28 = vld [vmem:[#allocation3 + $0x19] sm:$0xf] }
  0x37   :  { %563 = vmatpush3.msra.mxu1 %v264_v61  ;;  %521 = vmatprep.subr.mxu0 %v248_v63  ;;  %58 = vst.msk [vmem:[#allocation2 + $0x20] sm:$0xf] %vm57_vm6, %v52_v25  ;;  %152 = vst.msk [vmem:[#allocation2 + $0x30] sm:$0xf] %vm57_vm6, %v150_v27  ;;  %v153_v29 = vld [vmem:[#allocation3 + $0x13] sm:$0xff]  ;;  %v229_v4 = vld [vmem:[#allocation6 + $0x20] sm:$0xff]  ;;  %v203_v13 = vsel %vm93_vm3, %v201_v21, %v202_v26 }
  0x38   :  { %564 = vmatprep.subr.mxu1 %v279_v62  ;;  %522 = vmatpush3.msra.mxu0 %v232_v3  ;;  %v154_v30 = vld [vmem:[#allocation3 + $0x1b] sm:$0xf]  ;;  %211 = vst.msk [vmem:[#allocation2 + $0x38] sm:$0xff] %vm85_vm5, %v687_v0  ;;  %v115_v31 = vrot.slane %v111_v28, 4  ;;  %v157_v32 = vrot.slane %v153_v29, 4  ;;  %v275_v38 = vld [vmem:[#allocation6 + $0x190] sm:$0xff] }
  0x39   :  { %565 = vmatpush3.msra.mxu1 %v263_v1  ;;  %523 = vmatprep.subr.mxu0 %v247_v6  ;;  %v158_v33 = vrot.slane %v154_v30, 4  ;;  %v62_v34 = vld [vmem:[#allocation3 + $0x18] sm:$0x7]  ;;  %208 = vst.msk [vmem:[#allocation2 + $0x58] sm:$0x7f] %vm207_vm10, %v203_v13  ;;  %v259_v42 = vld [vmem:[#allocation6 + $0x110] sm:$0xff] }
  0x3a   :  { %566 = vmatprep.subr.mxu1 %v278_v2  ;;  %524 = vmatpush3.msra.mxu0 %v231_v11  ;;  %v260_v35 = vld [vmem:[#allocation6 + $0x118] sm:$0xff]  ;;  %v67_v37 = vrot.slane %v62_v34, 3  ;;  %212 = vst.msk [vmem:[#allocation2 + $0x58] sm:$0xff] %vm85_vm5, %v687_v0  ;;  %v116_v40 = vsel %vm93_vm3, %v114_v15, %v115_v31  ;;  %v243_v43 = vld [vmem:[#allocation6 + $0x90] sm:$0xff]  ;;  %v274_v0 = vld [vmem:[#allocation6 + $0x188] sm:$0xff] }
  0x3b   :  { %567 = vmatpush3.msra.mxu1 %v262_v5  ;;  %525 = vmatprep.subr.mxu0 %v246_v19  ;;  %v244_v36 = vld [vmem:[#allocation6 + $0x98] sm:$0xff]  ;;  %162 = vst.msk [vmem:[#allocation2 + $0x30] sm:$0xf0] %vm119_vm9, %v157_v32  ;;  %v159_v41 = vsel %vm93_vm3, %v157_v32, %v158_v33  ;;  %v227_v45 = vld [vmem:[#allocation6 + $0x10] sm:$0xff]  ;;  %v258_v46 = vld [vmem:[#allocation6 + $0x108] sm:$0xff] }
  0x3c   :  { %568 = vmatprep.subr.mxu1 %v277_v10  ;;  %526 = vmatpush3.msra.mxu0 %v230_v23  ;;  %v228_v39 = vld [vmem:[#allocation6 + $0x18] sm:$0xff]  ;;  %121 = vst.msk [vmem:[#allocation2 + $0x48] sm:$0xff] %vm73_vm4, %v116_v40  ;;  %163 = vst.msk [vmem:[#allocation2 + $0x50] sm:$0xff] %vm73_vm4, %v159_v41  ;;  %v68_v44 = vsel %vm65_vm11, %v66_v14, %v67_v37  ;;  %v273_v48 = vld [vmem:[#allocation6 + $0x180] sm:$0xff] }
  0x3d   :  { %569 = vmatpush3.msra.mxu1 %v261_v18  ;;  %527 = vmatprep.subr.mxu0 %v245_v24  ;;  %74 = vst.msk [vmem:[#allocation2 + $0x40] sm:$0xff] %vm73_vm4, %v68_v44  ;;  %v216_v47 = vld [vmem:[#allocation2 + $0x18] sm:$0xff]  ;;  %v242_v49 = vld [vmem:[#allocation6 + $0x88] sm:$0xff]  ;;  %v257_v50 = vld [vmem:[#allocation6 + $0x100] sm:$0xff] }
  0x3e   :  { %570 = vmatprep.subr.mxu1 %v276_v22  ;;  %528 = vmatpush3.msra.mxu0 %v229_v4  ;;  %v226_v7 = vld [vmem:[#allocation6 + $0x8] sm:$0xff]  ;;  %v241_v14 = vld [vmem:[#allocation6 + $0x80] sm:$0xff] }
  0x3f   :  { %571 = vmatpush3.msra.mxu1 %v260_v35  ;;  %529 = vmatprep.subr.mxu0 %v244_v36  ;;  %v225_v51 = vld [vmem:[#allocation6] sm:$0xff]  ;;  %v220_v56 = vld [vmem:[#allocation2 + $0x38] sm:$0xff] }
  0x40   :  { %572 = vmatprep.subr.mxu1 %v275_v38  ;;  %530 = vmatpush3.msra.mxu0 %v228_v39 }
  0x41   :  { %573 = vmatpush3.msra.mxu1 %v259_v42  ;;  %531 = vmatprep.subr.mxu0 %v243_v43  ;;  %v224_v9 = vld [vmem:[#allocation2 + $0x58] sm:$0xff] }
  0x42   :  { %574 = vmatprep.subr.mxu1 %v274_v0  ;;  %532 = vmatpush3.msra.mxu0 %v227_v45 }
  0x43   :  { %575 = vmatpush3.msra.mxu1 %v258_v46  ;;  %433 = vmatprep.mubr.f32.mxu1 %v216_v47 }
  0x44   :  { %576 = vmatprep.subr.mxu1 %v273_v48  ;;  %533 = vmatprep.subr.mxu0 %v242_v49 }
  0x45   :  { %577 = vmatpush3.msra.mxu1 %v257_v50  ;;  %534 = vmatpush3.msra.mxu0 %v226_v7 }
  0x46   :  { %535 = vmatprep.subr.mxu0 %v241_v14 }
  0x47   :  { %536 = vmatpush3.msra.mxu0 %v225_v51 }
  0x90   :  { %v169_v52 = vpop.permute.xlu1 %168 }
  0x91   :  { %v127_v53 = vpop.permute.xlu0 %126  ;;  %174 = vst.msk [vmem:[#allocation2 + $0x10] sm:$0xff] %vm85_vm5, %v169_v52 }
  0x92   :  { %132 = vst.msk [vmem:[#allocation2 + $0x8] sm:$0xff] %vm85_vm5, %v127_v53 }
  0x94   :  { %v129_v54 = vpop.permute.xlu1 %128 }
  0x95   :  { %v80_v55 = vpop.permute.xlu0 %79  ;;  %133 = vst.msk [vmem:[#allocation2 + $0x28] sm:$0xf] %vm87_vm12, %v129_v54 }
  0x96   :  { %86 = vst.msk [vmem:[#allocation2] sm:$0xff] %vm85_vm5, %v80_v55 }
  0x98   :  { %v82_v57 = vpop.permute.xlu1 %81  ;;  %v215_v60 = vld [vmem:[#allocation2 + $0x10] sm:$0xff] }
  0x99   :  { %v142_v58 = vpop.permute.xlu0 %141  ;;  %v214_v59 = vld [vmem:[#allocation2 + $0x8] sm:$0xff]  ;;  %88 = vst.msk [vmem:[#allocation2 + $0x20] sm:$0xf] %vm87_vm12, %v82_v57  ;;  %434 = vmatmul.mubr.f32.vlgmr.msra.gmra.mxu1 %v215_v60 }
  0x9a   :  { %147 = vst.msk [vmem:[#allocation2 + $0x28] sm:$0xf0] %vm103_vm13, %v142_v58  ;;  %353 = vmatprep.mubr.f32.mxu0 %v214_v59  ;;  %438 = vmatprep.mubr.f32.mxu1 %v220_v56 }
  0x9c   :  { %v171_v61 = vpop.permute.xlu1 %170 }
  0x9d   :  { %v98_v62 = vpop.permute.xlu0 %97  ;;  %v213_v63 = vld [vmem:[#allocation2] sm:$0xff]  ;;  %175 = vst.msk [vmem:[#allocation2 + $0x30] sm:$0xf] %vm87_vm12, %v171_v61 }
  0x9e   :  { %104 = vst.msk [vmem:[#allocation2 + $0x20] sm:$0xf0] %vm103_vm13, %v98_v62  ;;  %354 = vmatmul.mubr.f32.vlgmr.msra.gmra.mxu0 %v213_v63 }
  0xa0   :  { %v144_v1 = vpop.permute.xlu1 %143 }
  0xa1   :  { %v184_v2 = vpop.permute.xlu0 %183  ;;  %v218_v3 = vld [vmem:[#allocation2 + $0x28] sm:$0xff]  ;;  %148 = vst.msk [vmem:[#allocation2 + $0x48] sm:$0xff] %vm85_vm5, %v144_v1 }
  0xa2   :  { %189 = vst.msk [vmem:[#allocation2 + $0x30] sm:$0xf0] %vm103_vm13, %v184_v2  ;;  %358 = vmatprep.mubr.f32.mxu0 %v218_v3 }
  0xa4   :  { %v186_v5 = vpop.permute.xlu1 %185 }
  0xa5   :  { %v100_v6 = vpop.permute.xlu0 %99  ;;  %v217_v8 = vld [vmem:[#allocation2 + $0x20] sm:$0xff]  ;;  %190 = vst.msk [vmem:[#allocation2 + $0x50] sm:$0xff] %vm85_vm5, %v186_v5 }
  0xa6   :  { %105 = vst.msk [vmem:[#allocation2 + $0x40] sm:$0xff] %vm85_vm5, %v100_v6  ;;  %359 = vmatmul.mubr.f32.gmra.mxu0 %v217_v8 }
  0xa8   :  { %v222_v10 = vld [vmem:[#allocation2 + $0x48] sm:$0xff] }
  0xa9   :  { %v219_v11 = vld [vmem:[#allocation2 + $0x30] sm:$0xff]  ;;  %363 = vmatprep.mubr.f32.mxu0 %v222_v10 }
  0xaa   :  { %439 = vmatmul.mubr.f32.gmra.mxu1 %v219_v11 }
  0xab   :  { %443 = vmatprep.mubr.f32.mxu1 %v224_v9 }
  0xac   :  { %v223_v15 = vld [vmem:[#allocation2 + $0x50] sm:$0xff] }
  0xad   :  { %v221_v12 = vld [vmem:[#allocation2 + $0x40] sm:$0xff] }
  0xae   :  { %364 = vmatmul.mubr.f32.gmra.mxu0 %v221_v12  ;;  %444 = vmatmul.mubr.f32.gmra.mxu1 %v223_v15 }
 0x159   :  { %v578_v16 = vpop.f32.mrf.mxu1 }
 0x15b   :  { %v579_v17 = vpop.f32.mrf.mxu1 }
 0x15c   :  { %v580_v20 = vadd.f32 %v579_v17, %v578_v16 }
 0x15e   :  { %v537_v18 = vpop.f32.mrf.mxu0 }
 0x160   :  { %v538_v19 = vpop.f32.mrf.mxu0 }
 0x161   :  { %v539_v21 = vadd.f32 %v538_v19, %v537_v18 }
 0x163   :  { %v436_v22 = vadd.f32 %v580_v20, %v539_v21 }
 0x165   :  { %449 = vst [vmem:[#allocation8] sm:$0xff] %v436_v22  ;;  %v461_v35 = vmul.f32 %v436_v22, %v436_v22 }
 0x166   :  { %v540_v23 = vpop.f32.mrf.mxu0 }
 0x168   :  { %v541_v24 = vpop.f32.mrf.mxu0 }
 0x169   :  { %v542_v27 = vadd.f32 %v541_v24, %v540_v23 }
 0x16a   :  { %v581_v25 = vpop.f32.mrf.mxu1 }
 0x16c   :  { %v582_v26 = vpop.f32.mrf.mxu1 }
 0x16d   :  { %v583_v28 = vadd.f32 %v582_v26, %v581_v25 }
 0x16e   :  { %v543_v29 = vpop.f32.mrf.mxu0  ;;  %v584_v30 = vpop.f32.mrf.mxu1 }
 0x16f   :  { %v441_v4 = vadd.f32 %v583_v28, %v542_v27 }
 0x170   :  { %v544_v13 = vpop.f32.mrf.mxu0  ;;  %v585_v31 = vpop.f32.mrf.mxu1 }
 0x171   :  { %v462_v32 = vmul.f32 %v441_v4, %v441_v4  ;;  %450 = vst [vmem:[#allocation8 + $0x8] sm:$0xff] %v441_v4  ;;  %v545_v33 = vadd.f32 %v544_v13, %v543_v29  ;;  %v586_v34 = vadd.f32 %v585_v31, %v584_v30  ;;  %v452_v36 = vadd.f32 %v441_v4, %v436_v22 }
 0x173   :  { %v446_v37 = vadd.f32 %v586_v34, %v545_v33  ;;  %v464_v38 = vadd.f32 %v462_v32, %v461_v35 }
 0x175   :  { %v453_v39 = vadd.f32 %v452_v36, %v446_v37  ;;  %v463_v40 = vmul.f32 %v446_v37, %v446_v37  ;;  %451 = vst [vmem:[#allocation8 + $0x10] sm:$0xff] %v446_v37 }
 0x176   :  { %646 = shalt.err (!%p643_p0)
}
 0x177   :  { %484 = dma.vmem_to_hbm [thread:$0]  %s479_s24, 384, %s808_s2, [#allocation5], %s684_s15, %s684_s15, %s685_s16   ;;  %v454_v41 = vrot.slane %v453_v39, 4  ;;  %v465_v42 = vadd.f32 %v464_v38, %v463_v40 }
 0x178   :  { %s690_s28 = smov [#allocation9]  }
 0x179   :  { %v455_v43 = vadd.f32 %v454_v41, %v453_v39  ;;  %v466_v44 = vrot.slane %v465_v42, 4  ;;  %s491_s29 = sshll.u32 %s690_s28, 4  ;;  %s492_s29 = int_to_ptr.vmem [resolvable:$true] %s491_s29 }
 0x17a   :  { %s655_s30 = scalar_lea.vmem %s492_s29, 32  ;;  %p660_p2 = scmp.lt.s32.totalorder %s492_s29, %s492_s29 }
 0x17b   :  { %v456_v0 = vrot.slane %v455_v43, 2  ;;  %v467_v45 = vadd.f32 %v466_v44, %v465_v42  ;;  %p656_p1 = scmp.ne.s32.totalorder %s492_s29, %s655_s30  ;;  %p661_p3 = scmp.lt.s32.totalorder %s655_s30, %s655_s30 }
 0x17d   :  { %v457_v46 = vadd.f32 %v456_v0, %v455_v43  ;;  %v468_v47 = vrot.slane %v467_v45, 2  ;;  %p662_p4 = por %p661_p3, %p660_p2 }
 0x17f   :  { %v458_v48 = vrot.slane %v457_v46, 1  ;;  %v469_v49 = vadd.f32 %v468_v47, %v467_v45  ;;  %p663_p5 = pnand %p662_p4, %p656_p1 }
 0x181   :  { %v459_v50 = vadd.f32 %v458_v48, %v457_v46  ;;  %v470_v7 = vrot.slane %v469_v49, 1 }
 0x183   :  { %460 = vst [vmem:[#allocation9] sm:$0x1] %v459_v50  ;;  %v471_v14 = vadd.f32 %v470_v7, %v469_v49 }
 0x185   :  { %472 = vst [vmem:[#allocation9 + $0x1] sm:$0x1] %v471_v14 }
 0x186   :  { %666 = shalt.err (!%p663_p5)
}
 0x187   :  { %494 = dma.vmem_to_hbm [thread:$0]  %s492_s29, 32, %s809_s3, [#allocation10]  }
 0x188   :  { %679 = dma.done.wait [#allocation5], 384  }
 0x189   :  { %680 = vsyncadd [#allocation5], 4294966912 }
 0x18a   :  { %681 = dma.done.wait [#allocation10], 32  }
 0x18b   :  { %682 = vsyncadd [#allocation10], 4294967264 }
 0x18c   :  { %501 = vsyncpa [#allocation4], 1 }
 0x18d   :  { %502 = vsyncpa [#allocation7], 1 }
 0x18e   :  { %503 = vsyncpa [#allocation5], 1 }
 0x18f   :  { %504 = vsyncpa [#allocation10], 1 }

</bundles_post_ra>
